<compile_context>
chip_gen: v7x
topology: tpu7x:2x2x1
jax: 0.10.0
libtpu: 0.0.40
codegen_flags: <defaults>
</compile_context>

<pallas_src>
import math
import functools

import jax
import jax.numpy as jnp
from jax.experimental import pallas as pl
from jax.experimental.pallas import tpu as pltpu


# --------------------------------------------------------------------------
# Small helpers
# --------------------------------------------------------------------------
def _round_up(x, m):
    return ((x + m - 1) // m) * m


def _largest_tile(dim, target, align):
    """Largest t <= target with dim % t == 0 and t % align == 0 (else full dim)."""
    if dim <= target:
        return dim
    for t in range(min(target, dim), 0, -1):
        if dim % t == 0 and t % align == 0:
            return t
    return dim


def _tpu_defaults():
    """Generation-specific tile target / VMEM limit (safe fallback otherwise)."""
    kind = ""
    try:
        kind = jax.devices()[0].device_kind.lower()
    except Exception:
        pass
    if "v5e" in kind or "v5 lite" in kind or "v5lite" in kind:
        return dict(q_tile=128, vmem_limit=64 * 1024 * 1024)   # 128 MiB physical
    if "v6" in kind:
        return dict(q_tile=256, vmem_limit=96 * 1024 * 1024)   # big tiles on v6e
    if "v7" in kind:
        return dict(q_tile=128, vmem_limit=48 * 1024 * 1024)   # 64 MiB physical VMEM
    return dict(q_tile=128, vmem_limit=64 * 1024 * 1024)


def _choose_tq(T, Dh, cbytes, target, vmem_limit):
    """T-aware query tile: largest divisor of T whose per-step VMEM estimate fits."""
    cands = [t for t in range(min(target, T), 0, -1)
             if T % t == 0 and (t % 8 == 0 or t == T)]
    if not cands:
        cands = [T]
    budget = int(vmem_limit * 0.7)
    for tq in cands:
        wb = _round_up(T + tq, 128)
        tp_pad = _round_up(max(2 * T - 1, (T - tq) + wb), 128)
        kvp = 2 * (2 * T + tp_pad) * Dh * cbytes          # K,V,P (double buffered)
        qo = 4 * tq * Dh * max(cbytes, 4)                 # q in + ctx out
        temps = (2 * T + 4 * wb) * tq * 4                 # f32 score/pos/roll temps
        if kvp + qo + temps <= budget:
            return tq
    return cands[-1]


def _probe_roll_sign():
    """Resolve pltpu.roll's direction once at import (np.roll convention => +1)."""
    try:
        def _probe(x_ref, o_ref):
            o_ref[...] = pltpu.roll(x_ref[...], 1, 1)

        x = jnp.tile(jax.lax.iota(jnp.float32, 128)[None, :], (8, 1))
        y = jax.device_get(pl.pallas_call(
            _probe, out_shape=jax.ShapeDtypeStruct((8, 128), jnp.float32))(x))
        return 1 if float(y[0, 1]) == 0.0 else -1
    except Exception:
        return 1   # fall back to the documented (np.roll-like) convention


_ROLL_SIGN = _probe_roll_sign()


# --------------------------------------------------------------------------
# Input projection: y[b,h,t,:] = (x[b,t,:] @ W + b)[h*Dh:(h+1)*Dh]
# W and bias are fully VMEM-resident (fetched once); x is streamed exactly once.
# --------------------------------------------------------------------------
def _proj_heads_kernel(x_ref, w_ref, b_ref, o_ref, *, H, Dh):
    x = x_ref[0].astype(w_ref.dtype)                          # cast in VMEM, not in HBM
    y = jnp.dot(x, w_ref[...], preferred_element_type=jnp.float32) + b_ref[...]
    # Head-major output keeps the attention BlockSpecs legal for Dh < 128 lanes;
    # the per-head (tm, Dh) store is the only sub-128-lane store left in the pipeline.
    for h in range(H):
        o_ref[0, h] = y[:, h * Dh:(h + 1) * Dh].astype(o_ref.dtype)


def _project_heads(x, w, b, num_heads, cdt, row_target, vmem_limit):
    B, rows, D = x.shape
    H = num_heads
    Dh = D // H
    tm = _largest_tile(rows, row_target, 8)
    bias = (jnp.zeros((1, D), jnp.float32) if b is None
            else b.reshape(1, D).astype(jnp.float32))
    kernel = functools.partial(_proj_heads_kernel, H=H, Dh=Dh)
    return pl.pallas_call(
        kernel,
        grid=(B, rows // tm),
        in_specs=[
            pl.BlockSpec((1, tm, D), lambda bi, mi: (bi, mi, 0)),   # activation: read once
            pl.BlockSpec((D, D), lambda bi, mi: (0, 0)),            # weight: resident
            pl.BlockSpec((1, D), lambda bi, mi: (0, 0)),            # bias: resident
        ],
        out_specs=pl.BlockSpec((1, H, tm, Dh), lambda bi, mi: (bi, 0, mi, 0)),
        out_shape=jax.ShapeDtypeStruct((B, H, rows, Dh), cdt),
        compiler_params=pltpu.CompilerParams(
            dimension_semantics=("parallel", "parallel"),
            vmem_limit_bytes=vmem_limit),
    )(x, w.astype(cdt), bias)


# --------------------------------------------------------------------------
# Fused relative-position attention kernel.  grid = (B, H, T // tq).
# K/V/P index maps are constant in qb, so they are DMA'd once per (b, h).
# TODO(synk): for very long T, switch K/V/P to a KV-tile grid axis with online softmax.
# --------------------------------------------------------------------------
def _attn_kernel(*refs, T, tq, band_w, scale, nbits, has_mask, roll_sign):
    if has_mask:
        q_ref, k_ref, v_ref, p_ref, u_ref, vb_ref, m_ref, o_ref = refs
    else:
        q_ref, k_ref, v_ref, p_ref, u_ref, vb_ref, o_ref = refs
        m_ref = None

    q0 = pl.program_id(2) * tq

    q = q_ref[0, 0].astype(jnp.float32)       # (tq, Dh)
    k = k_ref[0, 0]                           # (T, Dh)   compute dtype
    v = v_ref[0, 0]                           # (T, Dh)
    u = u_ref[0].astype(jnp.float32)          # (1, Dh)
    vb = vb_ref[0].astype(jnp.float32)        # (1, Dh)

    # fold 1/sqrt(d_head) into the (query + bias) operands once
    qu = ((q + u) * scale).astype(k.dtype)
    qv = ((q + vb) * scale).astype(k.dtype)

    # content score: (tq, Dh) x (T, Dh)^T  (MXU)
    content = jax.lax.dot_general(qu, k, (((1,), (1,)), ((), ())),
                                  preferred_element_type=jnp.float32)     # (tq, T)

    # Band-sliced position score: only pe rows [T-tq-q0, T-tq-q0+band_w) can ever be
    # selected by the relative shift of this query tile (band_w ~= T + tq), which halves
    # the pos-score MXU work and shrinks the roll/select slab from ~2T to ~T+tq lanes.
    band_start = pl.multiple_of(T - tq - q0, 8)
    pe_band = p_ref[0, 0, pl.ds(band_start, band_w), :]                   # (band_w, Dh)
    pos_b = jax.lax.dot_general(qv, pe_band, (((1,), (1,)), ((), ())),
                                preferred_element_type=jnp.float32)       # (tq, band_w)

    # Relative shift (Transformer-XL): shifted[i, j] = pos_b[i, j + (tq - 1 - i)].
    # Per-row left-roll by (tq-1-i), binary-decomposed into ceil(log2(tq)) static
    # lane rolls (XLU) + per-row selects (VPU).
    amt = (tq - 1) - jax.lax.broadcasted_iota(jnp.int32, (tq, 1), 0)
    x = pos_b
    for bit in range(nbits):
        s = 1 << bit
        shift = (roll_sign * (-s)) % band_w       # positive shift == left-roll by s
        rolled = pltpu.roll(x, shift, 1)
        x = jnp.where((amt & s) != 0, rolled, x)
    shifted = x[:, :T]                            # (tq, T)

    score = content + shifted
    if m_ref is not None:
        # int8 mask, exact masked_fill(-10000) semantics; broadcasts over query rows.
        score = jnp.where(m_ref[0] != 0, -10000.0, score)

    # numerically-stable softmax over keys (f32 statistics)
    m = jnp.max(score, axis=-1, keepdims=True)
    p = jnp.exp(score - m)
    denom = jnp.sum(p, axis=-1, keepdims=True)
    attn = p * pl.reciprocal(denom, approx=True)
    # TODO(synk): nn.Dropout(p=0.1) on the attention weights is skipped (inference).

    ctx = jnp.dot(attn.astype(v.dtype), v, preferred_element_type=jnp.float32)
    o_ref[0, 0] = ctx.astype(o_ref.dtype)


def _attention(q_hm, k_hm, v_hm, p_hm, u_b, v_b, mask, T, tq, band_w, scale,
               vmem_limit):
    B, H, _, Dh = q_hm.shape
    Tp_pad = p_hm.shape[2]
    nq = T // tq
    nbits = max((tq - 1).bit_length(), 0)

    in_specs = [
        pl.BlockSpec((1, 1, tq, Dh), lambda b, h, qb: (b, h, qb, 0)),
        pl.BlockSpec((1, 1, T, Dh), lambda b, h, qb: (b, h, 0, 0)),
        pl.BlockSpec((1, 1, T, Dh), lambda b, h, qb: (b, h, 0, 0)),
        pl.BlockSpec((1, 1, Tp_pad, Dh), lambda b, h, qb: (b, h, 0, 0)),
        pl.BlockSpec((1, 1, Dh), lambda b, h, qb: (h, 0, 0)),
        pl.BlockSpec((1, 1, Dh), lambda b, h, qb: (h, 0, 0)),
    ]
    args = [q_hm, k_hm, v_hm, p_hm, u_b, v_b]
    has_mask = mask is not None
    if has_mask:
        if mask.shape[1] == 1:   # (B, 1, T) — broadcast over query rows
            in_specs.append(pl.BlockSpec((1, 1, T), lambda b, h, qb: (b, 0, 0)))
        else:                    # (B, T, T)
            in_specs.append(pl.BlockSpec((1, tq, T), lambda b, h, qb: (b, qb, 0)))
        args.append(mask)

    kernel = functools.partial(
        _attn_kernel, T=T, tq=tq, band_w=band_w, scale=scale, nbits=nbits,
        has_mask=has_mask, roll_sign=_ROLL_SIGN)

    return pl.pallas_call(
        kernel,
        grid=(B, H, nq),
        in_specs=in_specs,
        out_specs=pl.BlockSpec((1, 1, tq, Dh), lambda b, h, qb: (b, h, qb, 0)),
        out_shape=jax.ShapeDtypeStruct((B, H, T, Dh), q_hm.dtype),
        compiler_params=pltpu.CompilerParams(
            dimension_semantics=("parallel", "parallel", "arbitrary"),
            vmem_limit_bytes=vmem_limit),
    )(*args)


# --------------------------------------------------------------------------
# Output projection: out[b,t,:] = sum_h ctx[b,h,t,:] @ Wo[h*Dh:(h+1)*Dh, :] + bo
# Wo/bias fully resident, ctx read exactly once, lane-dense (tm, D) stores.
# --------------------------------------------------------------------------
def _out_proj_kernel(x_ref, w_ref, b_ref, o_ref, *, H, Dh):
    acc = jnp.dot(x_ref[0, 0], w_ref[0:Dh, :], preferred_element_type=jnp.float32)
    for h in range(1, H):
        acc = acc + jnp.dot(x_ref[0, h], w_ref[h * Dh:(h + 1) * Dh, :],
                            preferred_element_type=jnp.float32)
    o_ref[0] = (acc + b_ref[...]).astype(o_ref.dtype)


def _out_projection(ctx_hm, w, bias, out_dtype, cdt, row_target, vmem_limit):
    B, H, T, Dh = ctx_hm.shape
    D = H * Dh
    tm = _largest_tile(T, row_target, 8)
    kernel = functools.partial(_out_proj_kernel, H=H, Dh=Dh)
    return pl.pallas_call(
        kernel,
        grid=(B, T // tm),
        in_specs=[
            pl.BlockSpec((1, H, tm, Dh), lambda b, m: (b, 0, m, 0)),   # ctx: read once
            pl.BlockSpec((D, D), lambda b, m: (0, 0)),                 # Wo: resident
            pl.BlockSpec((1, D), lambda b, m: (0, 0)),                 # bias: resident
        ],
        out_specs=pl.BlockSpec((1, tm, D), lambda b, m: (b, m, 0)),
        out_shape=jax.ShapeDtypeStruct((B, T, D), out_dtype),
        compiler_params=pltpu.CompilerParams(
            dimension_semantics=("parallel", "parallel"),
            vmem_limit_bytes=vmem_limit),
    )(ctx_hm, w.astype(cdt), bias.reshape(1, D).astype(jnp.float32))


# --------------------------------------------------------------------------
# Module forward
# --------------------------------------------------------------------------
def relative_multi_head_attention(query, key, value, pos_embedding, params,
                                  num_heads, mask=None, *,
                                  compute_dtype=jnp.bfloat16, out_dtype=None):
    B, T, D = query.shape
    H = num_heads
    assert D % H == 0, "dim % num_heads must be zero"
    Dh = D // H
    assert key.shape == (B, T, D) and value.shape == (B, T, D), \
        "this kernel assumes time1 == time2 (self-attention)"
    Tp = pos_embedding.shape[1]
    if Tp != 2 * T - 1:
        raise ValueError(f"pos_embedding time dim must be 2*time-1, got {Tp} vs T={T}")

    cfg = _tpu_defaults()
    vmem_limit = cfg["vmem_limit"]
    cdt = compute_dtype
    cbytes = jnp.dtype(cdt).itemsize
    if out_dtype is None:
        out_dtype = query.dtype

    # T- and VMEM-aware query tile; band width for the relative shift.
    tq = _choose_tq(T, Dh, cbytes, cfg["q_tile"], vmem_limit)
    band_w = _round_up(T + tq, 128)
    Tp_pad = _round_up(max(Tp, (T - tq) + band_w), 128)   # zero lanes never selected
    pos_pad = jnp.pad(pos_embedding, ((0, 0), (0, Tp_pad - Tp), (0, 0)))

    row_target = 256
    q_hm = _project_heads(query, params['wq'], params['bq'], H, cdt, row_target, vmem_limit)
    k_hm = _project_heads(key, params['wk'], params['bk'], H, cdt, row_target, vmem_limit)
    v_hm = _project_heads(value, params['wv'], params['bv'], H, cdt, row_target, vmem_limit)
    p_hm = _project_heads(pos_pad, params['wp'], None, H, cdt, row_target, vmem_limit)

    mask_arg = None
    if mask is not None:
        m = jnp.asarray(mask)
        if m.ndim == 2:
            m = m[:, None, :]
        mask_arg = m.astype(jnp.int8)      # (B,1,T) or (B,T,T), 1 byte/elt

    ctx_hm = _attention(q_hm, k_hm, v_hm, p_hm,
                        params['u_bias'].reshape(H, 1, Dh).astype(jnp.float32),
                        params['v_bias'].reshape(H, 1, Dh).astype(jnp.float32),
                        mask_arg, T, tq, band_w, 1.0 / math.sqrt(Dh), vmem_limit)

    return _out_projection(ctx_hm, params['wo'], params['bo'], out_dtype, cdt,
                           row_target, vmem_limit)


# --------------------------------------------------------------------------
# Deterministic parameter init (xavier-uniform weights, zero biases)
# --------------------------------------------------------------------------
def init_params(key, dim, num_heads):
    d_head = dim // num_heads
    ks = jax.random.split(key, 7)

    def xavier(k, shape):
        bound = math.sqrt(6.0 / (shape[0] + shape[1]))
        return jax.random.uniform(k, shape, jnp.float32, -bound, bound)

    z = jnp.zeros((dim,), jnp.float32)
    return dict(
        wq=xavier(ks[0], (dim, dim)), bq=z,
        wk=xavier(ks[1], (dim, dim)), bk=z,
        wv=xavier(ks[2], (dim, dim)), bv=z,
        wp=xavier(ks[3], (dim, dim)),
        wo=xavier(ks[4], (dim, dim)), bo=z,
        u_bias=xavier(ks[5], (num_heads, d_head)),
        v_bias=xavier(ks[6], (num_heads, d_head)),
    )


# --------------------------------------------------------------------------
# Pure-JAX reference replicating the PyTorch forward (self-check)
# --------------------------------------------------------------------------
def _reference(query, key, value, pos_embedding, params, num_heads, mask=None):
    B, T, D = query.shape
    H = num_heads
    Dh = D // H

    def lin(x, w, b):
        return x @ w + b

    q = lin(query, params['wq'], params['bq']).reshape(B, -1, H, Dh)
    k = lin(key, params['wk'], params['bk']).reshape(B, -1, H, Dh).transpose(0, 2, 1, 3)
    v = lin(value, params['wv'], params['bv']).reshape(B, -1, H, Dh).transpose(0, 2, 1, 3)
    p = (pos_embedding @ params['wp']).reshape(B, -1, H, Dh)

    content = jnp.matmul((q + params['u_bias']).transpose(0, 2, 1, 3),
                         k.transpose(0, 1, 3, 2))
    pos_score = jnp.matmul((q + params['v_bias']).transpose(0, 2, 1, 3),
                           p.transpose(0, 2, 3, 1))
    b_, h_, t1, t2 = pos_score.shape
    zeros = jnp.zeros((b_, h_, t1, 1), pos_score.dtype)
    padded = jnp.concatenate([zeros, pos_score], axis=-1)
    padded = padded.reshape(b_, h_, t2 + 1, t1)
    pos_score = padded[:, :, 1:].reshape(b_, h_, t1, t2)[:, :, :, :t2 // 2 + 1]

    score = (content + pos_score) / math.sqrt(Dh)
    if mask is not None:
        score = jnp.where(mask[:, None], -10000.0, score)
    attn = jax.nn.softmax(score, axis=-1)
    ctx = jnp.matmul(attn, v).transpose(0, 2, 1, 3).reshape(B, -1, D)
    return lin(ctx, params['wo'], params['bo'])


if __name__ == "__main__":
    B, T, D, H = 2, 8, 32, 4
    Tp = 2 * T - 1

    root = jax.random.PRNGKey(0)
    k1, k2, k3, k4, kp = jax.random.split(root, 5)
    query = jax.random.normal(k1, (B, T, D), jnp.float32)
    key_t = jax.random.normal(k2, (B, T, D), jnp.float32)
    value = jax.random.normal(k3, (B, T, D), jnp.float32)
    pos_emb = jax.random.normal(k4, (B, Tp, D), jnp.float32)
    params = init_params(kp, D, H)

    # (batch, 1, time2) mask: last two key positions of batch 1 masked
    mask = jnp.zeros((B, 1, T), dtype=bool).at[1, 0, T - 2:].set(True)
    # (batch, time1, time2) mask: block the last key for late queries of batch 0
    mask_full = jnp.zeros((B, T, T), dtype=bool).at[0, 4:, T - 1].set(True)

    ref_m = _reference(query, key_t, value, pos_emb, params, H, mask=mask)
    ref_n = _reference(query, key_t, value, pos_emb, params, H, mask=None)
    ref_f = _reference(query, key_t, value, pos_emb, params, H, mask=mask_full)

    # f32 matmul path, (B,1,T) mask
    out = relative_multi_head_attention(query, key_t, value, pos_emb, params, H,
                                        mask=mask, compute_dtype=jnp.float32)
    out = jax.block_until_ready(out)
    assert out.shape == (B, T, D)
    err = float(jnp.max(jnp.abs(out - ref_m)))
    assert err < 2e-2, f"f32 masked mismatch: {err}"

    # f32 path, mask=None (specialized kernel, no mask traffic)
    out2 = relative_multi_head_attention(query, key_t, value, pos_emb, params, H,
                                         mask=None, compute_dtype=jnp.float32)
    out2 = jax.block_until_ready(out2)
    err2 = float(jnp.max(jnp.abs(out2 - ref_n)))
    assert err2 < 2e-2, f"f32 unmasked mismatch: {err2}"

    # f32 path, (B,T,T) mask branch
    out4 = relative_multi_head_attention(query, key_t, value, pos_emb, params, H,
                                         mask=mask_full, compute_dtype=jnp.float32)
    out4 = jax.block_until_ready(out4)
    err4 = float(jnp.max(jnp.abs(out4 - ref_f)))
    assert err4 < 2e-2, f"f32 full-mask mismatch: {err4}"

    # bf16 MXU path (f32 accumulation / softmax), loose tolerance
    out3 = relative_multi_head_attention(query, key_t, value, pos_emb, params, H,
                                         mask=mask, compute_dtype=jnp.bfloat16)
    out3 = jax.block_until_ready(out3)
    err3 = float(jnp.max(jnp.abs(out3 - ref_m)))
    assert err3 < 1.5e-1, f"bf16 masked mismatch: {err3}"

    print("KERNEL_OK")
</pallas_src>

<mosaic_0001>
module attributes {stable_mosaic.version = 11 : i64} {
  func.func @_probe(%arg0: memref<8x128xf32, #tpu.memory_space<vmem>>, %arg1: memref<8x128xf32, #tpu.memory_space<vmem>>) attributes {dimension_semantics = [], scalar_prefetch = 0 : i64, scratch_operands = 0 : i64, tpu.core_type = #tpu.core_type<tc>} {
    %c0 = arith.constant 0 : index
    %c0_0 = arith.constant 0 : index
    %0 = vector.load %arg0[%c0, %c0_0] : memref<8x128xf32, #tpu.memory_space<vmem>>, vector<8x128xf32>
    %c1_i32 = arith.constant 1 : i32
    %1 = tpu.dynamic_rotate %0 by %c1_i32 dim 1 : vector<8x128xf32>, i32 -> vector<8x128xf32>
    %c0_1 = arith.constant 0 : index
    %c0_2 = arith.constant 0 : index
    %2 = vector.load %arg1[%c0_1, %c0_2] : memref<8x128xf32, #tpu.memory_space<vmem>>, vector<8x128xf32>
    tpu.vector_store %arg1[%c0_1, %c0_2], %1 {strides = array<i32>} : memref<8x128xf32, #tpu.memory_space<vmem>>, vector<8x128xf32>,
    return
  }
}

module attributes {stable_mosaic.version = 11 : i64} {
  func.func @_proj_heads_kernel(%arg0: i32, %arg1: i32, %arg2: memref<1x8x32xf32, #tpu.memory_space<vmem>>, %arg3: memref<32x32xf32, #tpu.memory_space<vmem>>, %arg4: memref<1x32xf32, #tpu.memory_space<vmem>>, %arg5: memref<1x4x8x8xf32, #tpu.memory_space<vmem>>) attributes {dimension_semantics = [#tpu.dimension_semantics<parallel>, #tpu.dimension_semantics<parallel>], iteration_bounds = array<i64: 2, 1>, scalar_prefetch = 0 : i64, scratch_operands = 0 : i64, tpu.core_type = #tpu.core_type<tc>, window_params = [{transform_indices = @transform_0, window_bounds = array<i64: 1, 8, 32>}, {pipeline_mode = #tpu.pipeline_mode<synchronous>, transform_indices = @transform_1, window_bounds = array<i64: 32, 32>}, {pipeline_mode = #tpu.pipeline_mode<synchronous>, transform_indices = @transform_2, window_bounds = array<i64: 1, 32>}, {transform_indices = @transform_3, window_bounds = array<i64: 1, 4, 8, 8>}]} {
    %c0 = arith.constant 0 : index
    %c0_0 = arith.constant 0 : index
    %c0_1 = arith.constant 0 : index
    %0 = vector.load %arg2[%c0, %c0_0, %c0_1] : memref<1x8x32xf32, #tpu.memory_space<vmem>>, vector<1x8x32xf32>
    %1 = vector.shape_cast %0 : vector<1x8x32xf32> to vector<8x32xf32>
    %c0_2 = arith.constant 0 : index
    %c0_3 = arith.constant 0 : index
    %2 = vector.load %arg3[%c0_2, %c0_3] : memref<32x32xf32, #tpu.memory_space<vmem>>, vector<32x32xf32>
    %cst = arith.constant dense<0.000000e+00> : vector<8x32xf32>
    %3 = tpu.matmul %1, %2, %cst {dimension_numbers = #tpu.dot_dimension_numbers<[1], [0], [0], [1], [0, 0, 1, 1], [], []>} : vector<8x32xf32>, vector<32x32xf32>, vector<8x32xf32> -> vector<8x32xf32>
    %c0_4 = arith.constant 0 : index
    %c0_5 = arith.constant 0 : index
    %4 = vector.load %arg4[%c0_4, %c0_5] : memref<1x32xf32, #tpu.memory_space<vmem>>, vector<1x32xf32>
    %5 = vector.broadcast %4 : vector<1x32xf32> to vector<8x32xf32>
    %6 = arith.addf %3, %5 : vector<8x32xf32>
    %7 = vector.extract_strided_slice %6 {offsets = [0, 0], sizes = [8, 8], strides = [1, 1]} : vector<8x32xf32> to vector<8x8xf32>
    %c0_6 = arith.constant 0 : index
    %c0_7 = arith.constant 0 : index
    %c0_8 = arith.constant 0 : index
    %c0_9 = arith.constant 0 : index
    %8 = vector.load %arg5[%c0_6, %c0_7, %c0_8, %c0_9] : memref<1x4x8x8xf32, #tpu.memory_space<vmem>>, vector<1x1x8x8xf32>
    %9 = vector.shape_cast %8 : vector<1x1x8x8xf32> to vector<8x8xf32>
    %10 = vector.shape_cast %7 : vector<8x8xf32> to vector<1x1x8x8xf32>
    tpu.vector_store %arg5[%c0_6, %c0_7, %c0_8, %c0_9], %10 {strides = array<i32>} : memref<1x4x8x8xf32, #tpu.memory_space<vmem>>, vector<1x1x8x8xf32>,
    %11 = vector.extract_strided_slice %6 {offsets = [0, 8], sizes = [8, 8], strides = [1, 1]} : vector<8x32xf32> to vector<8x8xf32>
    %c0_10 = arith.constant 0 : index
    %c1 = arith.constant 1 : index
    %c0_11 = arith.constant 0 : index
    %c0_12 = arith.constant 0 : index
    %12 = vector.load %arg5[%c0_10, %c1, %c0_11, %c0_12] : memref<1x4x8x8xf32, #tpu.memory_space<vmem>>, vector<1x1x8x8xf32>
    %13 = vector.shape_cast %12 : vector<1x1x8x8xf32> to vector<8x8xf32>
    %14 = vector.shape_cast %11 : vector<8x8xf32> to vector<1x1x8x8xf32>
    tpu.vector_store %arg5[%c0_10, %c1, %c0_11, %c0_12], %14 {strides = array<i32>} : memref<1x4x8x8xf32, #tpu.memory_space<vmem>>, vector<1x1x8x8xf32>,
    %15 = vector.extract_strided_slice %6 {offsets = [0, 16], sizes = [8, 8], strides = [1, 1]} : vector<8x32xf32> to vector<8x8xf32>
    %c0_13 = arith.constant 0 : index
    %c2 = arith.constant 2 : index
    %c0_14 = arith.constant 0 : index
    %c0_15 = arith.constant 0 : index
    %16 = vector.load %arg5[%c0_13, %c2, %c0_14, %c0_15] : memref<1x4x8x8xf32, #tpu.memory_space<vmem>>, vector<1x1x8x8xf32>
    %17 = vector.shape_cast %16 : vector<1x1x8x8xf32> to vector<8x8xf32>
    %18 = vector.shape_cast %15 : vector<8x8xf32> to vector<1x1x8x8xf32>
    tpu.vector_store %arg5[%c0_13, %c2, %c0_14, %c0_15], %18 {strides = array<i32>} : memref<1x4x8x8xf32, #tpu.memory_space<vmem>>, vector<1x1x8x8xf32>,
    %19 = vector.extract_strided_slice %6 {offsets = [0, 24], sizes = [8, 8], strides = [1, 1]} : vector<8x32xf32> to vector<8x8xf32>
    %c0_16 = arith.constant 0 : index
    %c3 = arith.constant 3 : index
    %c0_17 = arith.constant 0 : index
    %c0_18 = arith.constant 0 : index
    %20 = vector.load %arg5[%c0_16, %c3, %c0_17, %c0_18] : memref<1x4x8x8xf32, #tpu.memory_space<vmem>>, vector<1x1x8x8xf32>
    %21 = vector.shape_cast %20 : vector<1x1x8x8xf32> to vector<8x8xf32>
    %22 = vector.shape_cast %19 : vector<8x8xf32> to vector<1x1x8x8xf32>
    tpu.vector_store %arg5[%c0_16, %c3, %c0_17, %c0_18], %22 {strides = array<i32>} : memref<1x4x8x8xf32, #tpu.memory_space<vmem>>, vector<1x1x8x8xf32>,
    return
  }
  func.func @transform_0(%arg0: i32, %arg1: i32) -> (i32, i32, i32) {
    %c0_i32 = arith.constant 0 : i32
    %c0_i32_0 = arith.constant 0 : i32
    return %arg0, %arg1, %c0_i32 : i32, i32, i32
  }
  func.func @transform_1(%arg0: i32, %arg1: i32) -> (i32, i32) {
    %c0_i32 = arith.constant 0 : i32
    %c0_i32_0 = arith.constant 0 : i32
    %c0_i32_1 = arith.constant 0 : i32
    return %c0_i32, %c0_i32_0 : i32, i32
  }
  func.func @transform_2(%arg0: i32, %arg1: i32) -> (i32, i32) {
    %c0_i32 = arith.constant 0 : i32
    %c0_i32_0 = arith.constant 0 : i32
    %c0_i32_1 = arith.constant 0 : i32
    return %c0_i32, %c0_i32_0 : i32, i32
  }
  func.func @transform_3(%arg0: i32, %arg1: i32) -> (i32, i32, i32, i32) {
    %c0_i32 = arith.constant 0 : i32
    %c0_i32_0 = arith.constant 0 : i32
    %c0_i32_1 = arith.constant 0 : i32
    return %arg0, %c0_i32, %arg1, %c0_i32_0 : i32, i32, i32, i32
  }
}

</mosaic_0001>

<bundles_post_ra>
// kernel: tpu_custom_call.1
= control target key start
LH: loop header
LB: loop body
LE: loop exit
PB: predicated region body
PF: predicated region fallthrough
CT: control target
= control target key end

     0   :  { %6 = vsyncpa [#allocation3], 0  ;;  %s128_s0 = inlined_call_operand.hbm [shape: f32[8,128], index: 0, kind: input, shape index: {}]   ;;  %s129_s1 = inlined_call_operand.hbm [shape: f32[8,128], index: 1, kind: output, shape index: {}]  }
   0x1   :  { %7 = vsyncpa [#allocation4], 0  ;;  %s91_s6 = smov [#allocation2]   ;;  %s43_s10 = scalar_lea.hbm %s128_s0, 128 }
   0x2   :  { %s14_s7 = sshll.u32 %s91_s6, 4  ;;  %p44_p0 = scmp.ne.s32.totalorder %s128_s0, %s43_s10  ;;  %s15_s7 = int_to_ptr.vmem [resolvable:$true] %s14_s7 }
   0x3   :  { %p47_p1 = scmp.lt.u32.totalorder %s43_s10, %s128_s0 }
   0x5   :  { %p49_p2 = pnand %p47_p1, %p44_p0 }
   0x7   :  { %52 = shalt.err (!%p49_p2)
}
   0x8   :  { %s53_s15 = scalar_lea.vmem %s15_s7, 128  ;;  %p58_p4 = scmp.lt.s32.totalorder %s15_s7, %s15_s7 }
   0x9   :  { %p54_p3 = scmp.ne.s32.totalorder %s15_s7, %s53_s15  ;;  %p59_p5 = scmp.lt.s32.totalorder %s53_s15, %s53_s15 }
   0xb   :  { %p60_p6 = por %p59_p5, %p58_p4 }
   0xd   :  { %p61_p7 = pnand %p60_p6, %p54_p3 }
   0xf   :  { %64 = shalt.err (!%p61_p7)
}
  0x10   :  { %17 = dma.hbm_to_vmem [thread:$0]  %s128_s0, 128, %s15_s7, [#allocation3]  }
  0x11   :  { %87 = dma.done.wait [#allocation3], 128  }
  0x12   :  { %88 = vsyncadd [#allocation3], 4294967168  ;;  %v21_v0 = vld [vmem:[#allocation2] sm:$0xff]  ;;  %s92_s18 = smov 1   ;;  %s93_s19 = smov [#allocation5]  }
  0x13   :  { %22 = vrot.lane.b32.xlu0 %v21_v0, %s92_s18  ;;  %s31_s20 = sshll.u32 %s93_s19, 4  ;;  %s32_s20 = int_to_ptr.vmem [resolvable:$true] %s31_s20 }
  0x14   :  { %s65_s21 = scalar_lea.vmem %s32_s20, 128  ;;  %p70_p9 = scmp.lt.s32.totalorder %s32_s20, %s32_s20 }
  0x15   :  { %p66_p8 = scmp.ne.s32.totalorder %s32_s20, %s65_s21  ;;  %p71_p10 = scmp.lt.s32.totalorder %s65_s21, %s65_s21 }
  0x17   :  { %p72_p11 = por %p71_p10, %p70_p9 }
  0x19   :  { %p73_p12 = pnand %p72_p11, %p66_p8 }
  0x85   :  { %v23_v1 = vpop.permute.xlu0 %22 }
  0x86   :  { %24 = vst [vmem:[#allocation5] sm:$0xff] %v23_v1 }
  0x87   :  { %76 = shalt.err (!%p73_p12)
}
  0x88   :  { %s77_s0 = scalar_lea.hbm %s129_s1, 128 }
  0x89   :  { %p78_p13 = scmp.ne.s32.totalorder %s129_s1, %s77_s0  ;;  %p81_p0 = scmp.lt.u32.totalorder %s77_s0, %s129_s1 }
  0x8b   :  { %p83_p1 = pnand %p81_p0, %p78_p13 }
  0x8d   :  { %86 = shalt.err (!%p83_p1)
}
  0x8e   :  { %34 = dma.vmem_to_hbm [thread:$0]  %s32_s20, 128, %s129_s1, [#allocation4]  }
  0x8f   :  { %89 = dma.done.wait [#allocation4], 128  }
  0x90   :  { %90 = vsyncadd [#allocation4], 4294967168 }
  0x91   :  { %38 = vsyncpa [#allocation3], 1 }
  0x92   :  { %39 = vsyncpa [#allocation4], 1 }

// kernel: tpu_custom_call.1
= control target key start
LH: loop header
LB: loop body
LE: loop exit
PB: predicated region body
PF: predicated region fallthrough
CT: control target
= control target key end

     0   :  { %8 = vsyncpa [#allocation3], 0  ;;  %s1057_s0 = inlined_call_operand.hbm [shape: f32[2,8,32], index: 0, kind: input, shape index: {}]   ;;  %s1058_s1 = inlined_call_operand.hbm [shape: f32[32,32], index: 1, kind: input, shape index: {}]   ;;  %s1059_s2 = inlined_call_operand.hbm [shape: f32[1,32], index: 2, kind: input, shape index: {}]   ;;  %s1060_s3 = inlined_call_operand.hbm [shape: f32[2,4,8,8], index: 3, kind: output, shape index: {}]  }
   0x1   :  { %10 = vsyncpa [#allocation3 + $0x1], 0 }
   0x2   :  { %11 = vsyncpa [#allocation6], 0 }
   0x3   :  { %12 = vsyncpa [#allocation4], 0 }
   0x4   :  { %14 = vsyncpa [#allocation4 + $0x1], 0  ;;  %s799_s12 = smov 0   ;;  %s801_s13 = smov 0  }
   0x5   :  { %s803_s14 = smov 0   ;;  %s805_s15 = smov 0  }
   0x6   :  { %s807_s16 = smov 0   ;;  %s809_s17 = smov 0  }
   0x7 LB: > { %s452_s18 = sadd.s32 4294967295, %s763_s17   ;;  %s453_s19 = sadd.s32 4294967294, %s763_s17   ;;  %s763_s17 = sphi %s809_s17, %s20_s17   ;;  %s759_s16 = sphi %s807_s16, %s1082_s16   ;;  %s755_s15 = sphi %s805_s15, %s1081_s15   ;;  %s751_s14 = sphi %s803_s14, %s1080_s14   ;;  %s747_s13 = sphi %s801_s13, %s1079_s13   ;;  %s743_s12 = sphi %s799_s12, %s1078_s12  }
   0x8   : > { %p54_p0 = scmp.ne.s32.totalorder %s747_s13, %s743_s12  ;;  %p833_p1 = scmp.eq.s32.totalorder %s452_s18, 0 }
   0x9   : > { %p837_p2 = scmp.eq.s32.totalorder %s452_s18, 1  ;;  %p128_p3 = scmp.eq.s32.totalorder %s453_s19, 1 }
   0xa   : > { %s1065_s20 = scalar_select %p833_p1, 1, 0 }
   0xb   : > { %p843_p4 = por %p833_p1, %p54_p0  ;;  %p454_p5 = scmp.ge.s32.totalorder %s763_s17, 1 }
   0xc   : > { %p848_p6 = por %p128_p3, %p54_p0  ;;  %p135_p7 = scmp.lt.s32.totalorder %s763_s17, 3 }
   0xd   : > { %s1067_s22 = scalar_select %p843_p4, 1, 0 }
   0xe   : > { %s1068_s23 = scalar_select %p848_p6, 1, 0 }
   0xf   : > { %p853_p8 = pnand %p454_p5, %p135_p7  ;;  %s765_s25 = smov [#allocation5]  }
  0x10   : > { %s147_s26 = sshll.u32 %s765_s25, 4  ;;  %s766_s28 = smov [#allocation7]   ;;  %s857_s26 = int_to_ptr.vmem [resolvable:$true] %s147_s26 }
  0x11   : > { %p510_p9 = pneg %p853_p8  ;;  %s161_s29 = sshll.u32 %s766_s28, 4  ;;  %s868_s29 = int_to_ptr.vmem [resolvable:$true] %s161_s29 }
  0x12   : > { %s591_s5 = scalar_lea.hbm %s1058_s1, 512 }
  0x13   : > { %p864_p11 = pnand %p510_p9, %p833_p1  ;;  %p592_p12 = scmp.ne.s32.totalorder %s1058_s1, %s591_s5 }
  0x14   : > { %p598_p5 = scmp.lt.u32.totalorder %s591_s5, %s1058_s1 }
  0x15   : > { %p593_p13 = pneg %p864_p11 }
  0x17   : > { %p594_p0 = pnand %p593_p13, %p592_p12 }
  0x19   : > { %p595_p3 = pneg %p594_p0 }
  0x1b   : > { %p600_p7 = pnand %p598_p5, %p595_p3 }
  0x1d   : > { %603 = shalt.err (!%p600_p7)
}
  0x1e   : > { %s604_s10 = scalar_lea.vmem %s857_s26, 512  ;;  %p612_p1 = scmp.lt.s32.totalorder %s857_s26, %s857_s26 }
  0x1f   : > { %p605_p9 = scmp.ne.s32.totalorder %s857_s26, %s604_s10  ;;  %p613_p12 = scmp.lt.s32.totalorder %s604_s10, %s604_s10 }
  0x21   : > { %p607_p10 = pnand %p605_p9, %p593_p13  ;;  %p614_p0 = por %p613_p12, %p612_p1 }
  0x23   : > { %p608_p6 = pneg %p607_p10 }
  0x25   : > { %p615_p4 = pnand %p614_p0, %p608_p6 }
  0x27   : > { %618 = shalt.err (!%p615_p4)
}
  0x28   : > { %s767_s11 = smov 128   ;;  %s768_s18 = smov 8  }
  0x29   : > { %513 = dma.hbm_to_vmem [thread:$0]  (!%p864_p11), %s1058_s1, 512, %s857_s26, [#allocation6], %s767_s11, %s767_s11, %s768_s18  }
  0x2a   : > { %s619_s4 = scalar_lea.hbm %s1059_s2, 16 }
  0x2b   : > { %p620_p1 = scmp.ne.s32.totalorder %s1059_s2, %s619_s4  ;;  %p626_p10 = scmp.lt.u32.totalorder %s619_s4, %s1059_s2 }
  0x2d   : > { %p622_p4 = pnand %p620_p1, %p593_p13 }
  0x2f   : > { %p623_p6 = pneg %p622_p4 }
  0x31   : > { %p628_p3 = pnand %p626_p10, %p623_p6 }
  0x33   : > { %631 = shalt.err (!%p628_p3)
}
  0x34   : > { %s632_s26 = scalar_lea.vmem %s868_s29, 16  ;;  %s639_s9 = scalar_lea.vmem %s868_s29, 32 }
  0x35   : > { %p633_p5 = scmp.ne.s32.totalorder %s868_s29, %s632_s26  ;;  %p640_p12 = scmp.lt.s32.totalorder %s868_s29, %s868_s29 }
  0x36   : > { %p641_p0 = scmp.lt.s32.totalorder %s639_s9, %s632_s26 }
  0x37   : > { %p635_p7 = pnand %p633_p5, %p593_p13 }
  0x38   : > { %p642_p1 = por %p641_p0, %p640_p12 }
  0x39   : > { %p636_p9 = pneg %p635_p7 }
  0x3b   : > { %p643_p4 = pnand %p642_p1, %p636_p9 }
  0x3d   : > { %646 = shalt.err (!%p643_p4)
}
  0x3e   : > { %516 = dma.hbm_to_vmem [thread:$0]  (!%p864_p11), %s1059_s2, 16, %s868_s29, [#allocation6]  }
  0x3f   : > { %s32_s18 = sadd.s32 1, %s759_s16  ;;  %s41_s19 = sadd.s32 1, %s751_s14 }
  0x40   : > { %p34_p13 = scmp.ge.s32.totalorder %s32_s18, 2  ;;  %p48_p6 = scmp.ne.s32.totalorder %s751_s14, %s747_s13 }
  0x41   : > { %p49_p10 = scmp.eq.s32.totalorder %s763_s17, 0  ;;  %p527_p3 = scmp.lt.s32.totalorder %s763_s17, 2 }
  0x42   : > { %s1084_s18 = smov (%p34_p13, %s32_s18), 0  ;;  %p933_p7 = por %p837_p2, %p48_p6 }
  0x43   : > { %p50_p5 = por %p49_p10, %p48_p6  ;;  %s36_s25 = ssub.s32 %s759_s16, %s1084_s18 }
  0x44   : > { %s1071_s27 = scalar_select %p933_p7, 1, 0 }
  0x45   : > { %s172_s28 = sand.u32 1, %s751_s14   ;;  %p39_p9 = scmp.eq.s32.totalorder %s36_s25, 0 }
  0x46   : > { %s458_s29 = sshll.u32 %s172_s28, 3  ;;  %s459_s30 = sshll.u32 %s759_s16, 7 }
  0x47   : > { %s942_s4 = scalar_select %p39_p9, %s751_s14, %s41_s19  }
  0x48   : > { %s947_s7 = scalar_lea.hbm %s1057_s0, %s459_s30  ;;  %s176_s21 = scalar_lea.vmem [#allocation2], %s458_s29 }
  0x49   : > { %s184_s8 = sshll.u32 %s176_s21, 4  ;;  %p951_p2 = pnand %p527_p3, %p50_p5  ;;  %s955_s8 = int_to_ptr.vmem [resolvable:$true] %s184_s8 }
  0x4a   : > { %s173_s9 = scalar_lea.sflag [#allocation3], %s172_s28  ;;  %s647_s10 = scalar_lea.hbm %s947_s7, 128 }
  0x4b   : > { %p648_p11 = scmp.ne.s32.totalorder %s947_s7, %s647_s10  ;;  %p649_p12 = pneg %p951_p2 }
  0x4c   : > { %s652_s25 = scalar_lea.hbm %s1057_s0, 256  ;;  %p653_p4 = scmp.lt.u32.totalorder %s947_s7, %s1057_s0 }
  0x4d   : > { %p650_p0 = pnand %p649_p12, %p648_p11  ;;  %p654_p13 = scmp.lt.u32.totalorder %s652_s25, %s647_s10 }
  0x4e   : > { %p656_p10 = scmp.lt.u32.totalorder %s647_s10, %s947_s7 }
  0x4f   : > { %p651_p1 = pneg %p650_p0  ;;  %p655_p6 = por %p654_p13, %p653_p4 }
  0x51   : > { %p657_p3 = por %p656_p10, %p655_p6 }
  0x53   : > { %p658_p5 = pnand %p657_p3, %p651_p1 }
  0x55   : > { %661 = shalt.err (!%p658_p5)
}
  0x56   : > { %s662_s28 = scalar_lea.vmem %s955_s8, 128  ;;  %s769_s5 = smov [#allocation2]  }
  0x57   : > { %p663_p9 = scmp.ne.s32.totalorder %s955_s8, %s662_s28  ;;  %s667_s6 = sshll.u32 %s769_s5, 4  ;;  %s668_s6 = int_to_ptr.vmem [resolvable:$false] %s667_s6 }
  0x58   : > { %s669_s21 = scalar_lea.vmem %s668_s6, 256  ;;  %p670_p7 = scmp.lt.s32.totalorder %s955_s8, %s668_s6 }
  0x59   : > { %p665_p11 = pnand %p663_p9, %p649_p12  ;;  %p671_p4 = scmp.lt.s32.totalorder %s669_s21, %s662_s28 }
  0x5b   : > { %p666_p0 = pneg %p665_p11  ;;  %p672_p13 = por %p671_p4, %p670_p7 }
  0x5d   : > { %p673_p6 = pnand %p672_p13, %p666_p0 }
  0x5f   : > { %676 = shalt.err (!%p673_p6)
}
  0x60   : > { %520 = dma.hbm_to_vmem [thread:$0]  (!%p951_p2), %s947_s7, 128, %s955_s8, %s173_s9  }
  0x61   : > { %193 = sbr.rel (%p853_p8) target bundleno = 467 (0x1d3), region = 32  ;;  %s985_s10 = sand.u32 (!%p853_p8), 1, %s747_s13  }
  0x62   : > { %s461_s11 = sshll.u32 (!%p853_p8), %s985_s10, 3  ;;  %s196_s19 = scalar_lea.sflag (!%p853_p8), [#allocation3], %s985_s10 }
  0x63   : > { %s199_s25 = scalar_lea.vmem (!%p853_p8), [#allocation2], %s461_s11  ;;  %p1073_p7 = scmp.ne.s32.totalorder (!%p853_p8), %s1067_s22, 0 }
  0x68   : > { %730 = dma.done.wait (%p1073_p7), %s196_s19, 128  }
  0x69   : > { %732 = vsyncadd (%p1073_p7), %s196_s19, 4294967168  ;;  %p1074_p12 = scmp.ne.s32.totalorder %s1065_s20, 0 }
  0x6b   : > { %734 = dma.done.wait (%p1074_p12), [#allocation6], 528  }
  0x6c   : > { %736 = vsyncadd (%p1074_p12), [#allocation6], 4294966768  ;;  %v770_v0 = vmov 0.0|0.0   ;;  %vm771_vm0 = vmmov 0   ;;  %v772_v1 = vmov 0.0   ;;  %v231_v2 = vld [vmem:[#allocation5] sm:$0xff] }
  0x6d   : > { %492 = vmatprep.subr.bf16.mxu0 %v770_v0  ;;  %489 = vmatprep.mubr.msk.f32.mxu0 %vm771_vm0, %v772_v1  ;;  %v232_v3 = vld [vmem:[#allocation5 + $0x8] sm:$0xff]  ;;  %v233_v4 = vld [vmem:[#allocation5 + $0x10] sm:$0xff]  ;;  %v234_v6 = vld [vmem:[#allocation5 + $0x18] sm:$0xff]  ;;  %vm242_vm1 = vcmask 261120   ;;  %s464_s20 = sshll.u32 %s985_s10, 5  ;;  %vm316_vm2 = vcmask 64512  }
  0x6e   : > { %v493_v5 = vpack.c.bf16 %v232_v3, %v231_v2  ;;  %v496_v7 = vpack.c.bf16 %v234_v6, %v233_v4  ;;  %v230_v8 = vld [vmem:[%s199_s25] sm:$0xff]  ;;  %v465_v9 = vld [vmem:[#allocation7] ss:$0 sm:$0xff]  ;;  %s773_s22 = smov 104   ;;  %s774_s24 = smov 120  }
  0x6f   : > { %s229_s7 = scalar_lea.vmem [#allocation8], %s464_s20  ;;  %s775_s8 = smov 112  }
  0x70   : > { %494 = vmatpush3.bf16.msra.mxu0 %v493_v5  ;;  %s349_s26 = sshll.u32 %s229_s7, 4  ;;  %s475_s9 = sshll.u32 %s755_s15, 9  ;;  %s1000_s26 = int_to_ptr.vmem [resolvable:$true] %s349_s26 }
  0x71   : > { %495 = vmatprep.subr.bf16.mxu0 %v770_v0  ;;  %s1007_s28 = scalar_lea.hbm %s1060_s3, %s475_s9  ;;  %s335_s15 = scalar_lea.sflag [#allocation4], %s985_s10 }
  0x72   : > { %s677_s5 = scalar_lea.vmem %s1000_s26, 512  ;;  %p1075_p2 = scmp.ne.s32.totalorder %s1071_s27, 0 }
  0x73   : > { %p678_p8 = scmp.ne.s32.totalorder %s1000_s26, %s677_s5  ;;  %s776_s6 = smov [#allocation8]  }
  0x74   : > { %497 = vmatpush3.bf16.msra.mxu0 %v496_v7  ;;  %s681_s21 = sshll.u32 %s776_s6, 4  ;;  %s682_s21 = int_to_ptr.vmem [resolvable:$false] %s681_s21 }
  0x75   : > { %p679_p1 = pnand %p678_p8, %p1075_p2  ;;  %s683_s11 = scalar_lea.vmem %s682_s21, 1024 }
  0x76   : > { %p684_p3 = scmp.lt.s32.totalorder %s1000_s26, %s682_s21  ;;  %p685_p5 = scmp.lt.s32.totalorder %s683_s11, %s677_s5 }
  0x77   : > { %490 = vmatmul.mubr.msk.f32.vlgmr.msra.gmra.mrb[0].mxu0 %vm242_vm1, %v230_v8  ;;  %p680_p10 = pneg %p679_p1 }
  0x78   : > { %p686_p9 = por %p685_p5, %p684_p3 }
  0x7a   : > { %p687_p11 = pnand %p686_p9, %p680_p10 }
 0x14a   : > { %v312_v10 = vpop.f32.mrb[0].mxu0 }
 0x14b   : > { %v313_v11 = vadd.f32 %v465_v9, %v312_v10  ;;  %v491_v12 = vpop.f32.mrb[1].mxu0 }
 0x14d   : > { %329 = vrot.lane.b32.xlu1 %v313_v11, %s773_s22  ;;  %319 = vrot.lane.b32.xlu0 %v313_v11, %s774_s24  ;;  %317 = vst.msk [vmem:[%s229_s7] sm:$0xff] %vm316_vm2, %v313_v11 }
 0x151   : > { %324 = vrot.lane.b32.xlu0 %v313_v11, %s775_s8 }
 0x1bf   : > { %v330_v13 = vpop.permute.xlu1 %329  ;;  %v320_v14 = vpop.permute.xlu0 %319 }
 0x1c0   : > { %469 = vst.msk [vmem:[%s229_s7 + $0x18] sm:$0xff] %vm316_vm2, %v330_v13  ;;  %467 = vst.msk [vmem:[%s229_s7 + $0x8] sm:$0xff] %vm316_vm2, %v320_v14 }
 0x1c3   : > { %v325_v15 = vpop.permute.xlu0 %324 }
 0x1c4   : > { %468 = vst.msk [vmem:[%s229_s7 + $0x10] sm:$0xff] %vm316_vm2, %v325_v15 }
 0x1c5   : > { %690 = shalt.err (!%p687_p11)
}
 0x1c6   : > { %s691_s19 = scalar_lea.hbm %s1007_s28, 512  ;;  %s695_s22 = scalar_lea.hbm %s1060_s3, 1024 }
 0x1c7   : > { %p692_p0 = scmp.ne.s32.totalorder %s1007_s28, %s691_s19  ;;  %p696_p6 = scmp.lt.u32.totalorder %s1007_s28, %s1060_s3 }
 0x1c8   : > { %p697_p7 = scmp.lt.u32.totalorder %s695_s22, %s691_s19  ;;  %p699_p8 = scmp.lt.u32.totalorder %s691_s19, %s1007_s28 }
 0x1c9   : > { %p693_p4 = pnand %p692_p0, %p1075_p2 }
 0x1ca   : > { %p698_p12 = por %p697_p7, %p696_p6 }
 0x1cb   : > { %p694_p13 = pneg %p693_p4 }
 0x1cc   : > { %p700_p1 = por %p699_p8, %p698_p12 }
 0x1ce   : > { %p701_p10 = pnand %p700_p1, %p694_p13 }
 0x1d0   : > { %704 = shalt.err (!%p701_p10)
}
 0x1d1   : > { %s777_s8 = smov 128   ;;  %s778_s9 = smov 8  }
 0x1d2   : > { %508 = dma.vmem_to_hbm [thread:$0]  (%p1075_p2), %s1000_s26, 512, %s1007_s28, %s335_s15, %s777_s8, %s777_s8, %s778_s9  }
 0x1d3 PF: > { %s364_s29 = sand.u32 1, %s743_s12   ;;  %p1076_p3 = scmp.ne.s32.totalorder %s1068_s23, 0 }
 0x1d4   : > { %p1077_p5 = scmp.ge.s32.totalorder %s763_s17, 2  ;;  %s365_s30 = scalar_lea.sflag [#allocation4], %s364_s29 }
 0x1d6   : > { %p522_p9 = pnand %p1077_p5, %p1076_p3 }
 0x1d8   : > { %738 = dma.done.wait (!%p522_p9), %s365_s30, 512  }
 0x1d9   : > { %740 = vsyncadd (!%p522_p9), %s365_s30, 4294966784  ;;  %s20_s17 = sadd.s32 1, %s763_s17   ;;  %s1078_s12 = smov %s747_s13 }
 0x1da   : > { %p17_p11 = scmp.ge.s32.totalorder %s20_s17, 4   ;;  %s1079_s13 = smov %s751_s14 }
 0x1db   : > { %s1080_s14 = smov %s942_s4  ;;  %s1081_s15 = smov %s759_s16 }
 0x1dc   : > { %s1082_s16 = smov %s1084_s18  ;;  %19 = sbr.rel (!%p17_p11) target bundleno = 7 (0x7), region = 88 }
 0x1e3   :  { %370 = vsyncpa [#allocation3], 1 }
 0x1e4   :  { %372 = vsyncpa [#allocation3 + $0x1], 1 }
 0x1e5   :  { %373 = vsyncpa [#allocation6], 1 }
 0x1e6   :  { %374 = vsyncpa [#allocation4], 1 }
 0x1e7   :  { %376 = vsyncpa [#allocation4 + $0x1], 1 }

</bundles_post_ra>
